<compile_context>
chip_gen: v7x
topology: tpu7x:2x2x1
jax: 0.10.0
libtpu: 0.0.40
codegen_flags: <defaults>
</compile_context>

<pallas_src>
import functools

import jax
import jax.numpy as jnp
from jax.experimental import pallas as pl
from jax.experimental.pallas import tpu as pltpu


def identity_map(x: jax.Array) -> jax.Array:
    """IdentityMap.forward: a true no-op — the optimal kernel is no kernel."""
    return x


def _identity_dma_copy_kernel(x_hbm_ref, o_hbm_ref, dma_sem):
    # Single whole-ref HBM->HBM DMA.  No VMEM staging, no grid, no padding:
    # the DMA engine streams the bytes at copy roofline on every generation.
    cp = pltpu.make_async_copy(x_hbm_ref, o_hbm_ref, dma_sem)
    cp.start()
    cp.wait()


def identity_map_pallas_copy(x: jax.Array, *, donate: bool = False) -> jax.Array:
    """Explicit Pallas pass-through copy (only when a physical copy is needed).

    Implementation: one `pallas_call` with `memory_space=pl.ANY` input/output
    refs and a single whole-array async copy — any shape, any rank, no
    (8,128)-alignment plumbing, no pad/slice round trips.

    donate=True adds input_output_aliases={0: 0}; pair it with caller-side
    donation (see `identity_map_pallas_copy_donated`) so the output reuses the
    input buffer instead of allocating a new one.  (For a true identity the
    zero-cost path `identity_map` is still strictly better.)
    """
    if x.size == 0:
        return x  # nothing to copy; avoids issuing a 0-byte DMA.

    nbytes = int(x.size) * jnp.dtype(x.dtype).itemsize

    return pl.pallas_call(
        _identity_dma_copy_kernel,
        out_shape=jax.ShapeDtypeStruct(x.shape, x.dtype),
        in_specs=[pl.BlockSpec(memory_space=pl.ANY)],
        out_specs=pl.BlockSpec(memory_space=pl.ANY),
        scratch_shapes=[pltpu.SemaphoreType.DMA(())],
        # Purely memory-bound custom call: tell XLA's scheduler so it can
        # overlap neighbouring ops with this copy.
        cost_estimate=pl.CostEstimate(
            flops=0, transcendentals=0, bytes_accessed=2 * nbytes
        ),
        input_output_aliases=({0: 0} if donate else {}),
    )(x)


# Donation actually wired up (not just a comment): the caller's buffer is
# donated via jit, and the pallas_call aliases output 0 onto input 0, so no
# fresh HBM output buffer is allocated for the pass-through.
@functools.partial(jax.jit, donate_argnums=(0,))
def identity_map_pallas_copy_donated(x: jax.Array) -> jax.Array:
    return identity_map_pallas_copy(x, donate=True)


if __name__ == "__main__":
    key = jax.random.PRNGKey(0)
    # Small NCHW input consistent with a projector pass-through.
    x = jax.random.normal(key, (2, 4, 16, 16), dtype=jnp.float32)

    # 1) The module's forward is a pure identity (zero-cost path).
    y_fast = identity_map(x)
    assert y_fast is x

    # 2) Explicit Pallas pass-through copy: whole-ref HBM->HBM DMA.
    y = identity_map_pallas_copy(x)
    jax.block_until_ready(y)
    assert y.shape == x.shape
    assert y.dtype == x.dtype
    assert bool(jnp.array_equal(y, x))

    # 3) Donating path: output aliases the donated input buffer.
    x_donor = jnp.array(x)  # fresh buffer so the original x stays valid
    y_donated = identity_map_pallas_copy_donated(x_donor)
    jax.block_until_ready(y_donated)
    assert y_donated.shape == x.shape
    assert y_donated.dtype == x.dtype
    assert bool(jnp.array_equal(y_donated, x))

    print("KERNEL_OK")
</pallas_src>

<mosaic_0001>
module attributes {stable_mosaic.version = 11 : i64} {
  func.func @_identity_dma_copy_kernel(%arg0: memref<2x4x16x16xf32, #tpu.memory_space<any>>, %arg1: memref<2x4x16x16xf32, #tpu.memory_space<any>>, %arg2: memref<!tpu.dma_semaphore, #tpu.memory_space<semaphore_mem>>) attributes {dimension_semantics = [], scalar_prefetch = 0 : i64, scratch_operands = 1 : i64, tpu.core_type = #tpu.core_type<tc>} {
    tpu.enqueue_dma source(%arg0 : memref<2x4x16x16xf32, #tpu.memory_space<any>>) target(%arg1 : memref<2x4x16x16xf32, #tpu.memory_space<any>>) target_semaphore(%arg2 : memref<!tpu.dma_semaphore, #tpu.memory_space<semaphore_mem>>)
    tpu.wait_dma2 semaphore(%arg2 : memref<!tpu.dma_semaphore, #tpu.memory_space<semaphore_mem>>) src(%arg0 : memref<2x4x16x16xf32, #tpu.memory_space<any>>) dst(%arg1 : memref<2x4x16x16xf32, #tpu.memory_space<any>>)
    return
  }
}

</mosaic_0001>

<bundles_post_ra>
// kernel: tpu_custom_call.1
= control target key start
LH: loop header
LB: loop body
LE: loop exit
PB: predicated region body
PF: predicated region fallthrough
CT: control target
= control target key end

     0   :  { %s36_s6 = smov [#allocation2]   ;;  %s37_s7 = smov [#allocation3]   ;;  %s55_s0 = inlined_call_operand.hbm [shape: f32[2,4,16,16], index: 0, kind: input, shape index: {}]   ;;  %s56_s1 = inlined_call_operand.hbm [shape: f32[2,4,16,16], index: 1, kind: output, shape index: {}]  }
   0x1   :  { %s38_s8 = smov 0  }
   0x2   :  { %18 = dma.general %s55_s0, 2048, %s56_s1, %s36_s6, %s37_s7, [#allocation4], %s38_s8, 0  }
   0x3   :  { %34 = dma.done.wait [#allocation2], 2048 }
   0x4   :  { %35 = vsyncadd [#allocation2], 4294965248 }
   0x5   :  { %24 = vsyncmov [#allocation2] }
   0x8   :  { %s25_s13 = vpop.sfrf %24 }
   0x9   :  { %p30_p0 = scmp.ne.s32.totalorder %s25_s13, 0 }
   0xb   :  { %29 = shalt.err (%p30_p0)  }

</bundles_post_ra>
